<compile_context>
chip_gen: v6e
topology: v6e:2x2x1
jax: 0.10.0
libtpu: 0.0.40
codegen_flags: <defaults>
</compile_context>

<pallas_src>
import math
import functools

import numpy as np
import jax
import jax.numpy as jnp
from jax import lax
from jax.experimental import pallas as pl
from jax.experimental.pallas import tpu as pltpu

_TM_MAX = 256  # max row tile for the row-parallel (LN+matmul / LN+MLP) kernels


def _round_up(x, m):
    return ((x + m - 1) // m) * m


def _pick_tile(M):
    """Largest row tile <= _TM_MAX, multiple of 8; returns (tile, padded_M)."""
    if M <= _TM_MAX:
        t = _round_up(max(M, 1), 8)
        return t, t
    return _TM_MAX, _round_up(M, _TM_MAX)


# ----------------------------- Pallas kernels -----------------------------

def _ln_matmul_kernel(x_ref, g_ref, b_ref, w_ref, bias_ref, o_ref, *, eps):
    """Fused LayerNorm -> x @ W + b (used for the QKV projection)."""
    x = x_ref[...].astype(jnp.float32)
    mu = jnp.mean(x, axis=-1, keepdims=True)
    var = jnp.mean((x - mu) ** 2, axis=-1, keepdims=True)
    xn = (x - mu) * lax.rsqrt(var + eps) * g_ref[...] + b_ref[...]
    acc = jnp.dot(xn, w_ref[...].astype(jnp.float32),
                  preferred_element_type=jnp.float32) + bias_ref[...]
    o_ref[...] = acc.astype(o_ref.dtype)


def _ln_mlp_kernel(x_ref, g_ref, b_ref, w1_ref, b1_ref, w2_ref, b2_ref, o_ref, *, eps):
    """Fused LayerNorm -> Linear -> GELU -> Linear -> residual add."""
    x = x_ref[...].astype(jnp.float32)
    mu = jnp.mean(x, axis=-1, keepdims=True)
    var = jnp.mean((x - mu) ** 2, axis=-1, keepdims=True)
    xn = (x - mu) * lax.rsqrt(var + eps) * g_ref[...] + b_ref[...]
    h = jnp.dot(xn, w1_ref[...].astype(jnp.float32),
                preferred_element_type=jnp.float32) + b1_ref[...]
    # TODO(synk): PyTorch nn.GELU defaults to exact erf; tanh approximation used here.
    h = jax.nn.gelu(h, approximate=True)
    y = jnp.dot(h, w2_ref[...].astype(jnp.float32),
                preferred_element_type=jnp.float32) + b2_ref[...]
    o_ref[...] = (x + y).astype(o_ref.dtype)


def _attn_block_kernel(z_ref, qkv_ref, gq_ref, gk_ref, scat_ref, bias_ref, wo_ref, bo_ref,
                       o_ref, *, nW, windowSize, receptiveSize, numHeads, headDim, scale):
    """Fused window attention for ONE batch element per grid step.

    Window gather is a static matrix multiply (gq: (nW*Lq, L), gk: (nW*Lk, L)), the
    overlap-averaged writeback is another static matrix multiply (scat: (L, nW*Lq) with
    1/count folded in), so everything runs on the MXU and never leaves VMEM.
    """
    HD = numHeads * headDim
    Lq = 1 + windowSize
    Lk = 1 + receptiveSize
    z = z_ref[0].astype(jnp.float32)          # (L, dim)
    qkv = qkv_ref[0].astype(jnp.float32)      # (L, 3*HD)

    q_all = qkv[:, :HD]
    k_all = qkv[:, HD:2 * HD]
    v_all = qkv[:, 2 * HD:]

    gq = gq_ref[...]                          # (nW*Lq, L)
    gk = gk_ref[...]                          # (nW*Lk, L)

    q_win = jnp.dot(gq, q_all, preferred_element_type=jnp.float32).reshape(nW, Lq, HD)
    k_win = jnp.dot(gk, k_all, preferred_element_type=jnp.float32).reshape(nW, Lk, HD)
    v_win = jnp.dot(gk, v_all, preferred_element_type=jnp.float32).reshape(nW, Lk, HD)

    bias = bias_ref[...]                      # (nW, Lk): 0 / -1e9 key-validity mask
    # TODO(synk): BolT's learnable relative-position bias table (attentionBias=True) is
    # omitted (BolTransformerBlock source not provided); only the validity mask is applied.

    head_outs = []
    for h in range(numHeads):
        sl = slice(h * headDim, (h + 1) * headDim)
        s = jnp.einsum('nqd,nkd->nqk', q_win[:, :, sl], k_win[:, :, sl],
                       preferred_element_type=jnp.float32) * scale
        s = s + bias[:, None, :]
        s = s - jnp.max(s, axis=-1, keepdims=True)
        p = jnp.exp(s)
        p = p * pl.reciprocal(jnp.sum(p, axis=-1, keepdims=True), approx=True)
        head_outs.append(jnp.einsum('nqk,nkd->nqd', p, v_win[:, :, sl],
                                    preferred_element_type=jnp.float32))
    o = jnp.concatenate(head_outs, axis=-1).reshape(nW * Lq, HD)

    # Fused output projection (lane axis = dim in the result).
    proj = jnp.dot(o, wo_ref[...].astype(jnp.float32),
                   preferred_element_type=jnp.float32) + bo_ref[...]   # (nW*Lq, dim)

    # Overlap-averaged scatter back to [cls ; tokens] layout + residual add.
    upd = jnp.dot(scat_ref[...], proj, preferred_element_type=jnp.float32)   # (L, dim)
    o_ref[0] = (z + upd).astype(o_ref.dtype)


def _postnorm_pool_head_kernel(cls_ref, g_ref, b_ref, w_ref, bias_ref,
                               cls_out_ref, logits_ref, *, eps):
    """Fused encoder postNorm + mean-pool over windows + classifier head (per batch elem)."""
    x = cls_ref[0].astype(jnp.float32)        # (nW, dim)
    mu = jnp.mean(x, axis=-1, keepdims=True)
    var = jnp.mean((x - mu) ** 2, axis=-1, keepdims=True)
    xn = (x - mu) * lax.rsqrt(var + eps) * g_ref[...] + b_ref[...]
    cls_out_ref[0] = xn.astype(cls_out_ref.dtype)
    pooled = jnp.mean(xn, axis=0, keepdims=True)                       # (1, dim)
    logits = jnp.dot(pooled, w_ref[...].astype(jnp.float32),
                     preferred_element_type=jnp.float32) + bias_ref[...]
    logits_ref[0] = logits.astype(logits_ref.dtype)


# ----------------------------- Pallas wrappers -----------------------------

def ln_matmul(x2d, gamma, beta, w, b, eps=1e-5):
    """Fused LN + projection (single kernel, one HBM round trip for the activations)."""
    M, K = x2d.shape
    N = w.shape[1]
    tm, Mp = _pick_tile(M)
    xp = jnp.pad(x2d, ((0, Mp - M), (0, 0)))
    out = pl.pallas_call(
        functools.partial(_ln_matmul_kernel, eps=eps),
        out_shape=jax.ShapeDtypeStruct((Mp, N), x2d.dtype),
        grid=(Mp // tm,),
        in_specs=[pl.BlockSpec((tm, K), lambda i: (i, 0)),
                  pl.BlockSpec((1, K), lambda i: (0, 0)),
                  pl.BlockSpec((1, K), lambda i: (0, 0)),
                  pl.BlockSpec((K, N), lambda i: (0, 0)),
                  pl.BlockSpec((1, N), lambda i: (0, 0))],
        out_specs=pl.BlockSpec((tm, N), lambda i: (i, 0)),
        compiler_params=pltpu.CompilerParams(dimension_semantics=("parallel",)),
    )(xp, gamma.reshape(1, K), beta.reshape(1, K), w, b.reshape(1, N))
    return out[:M]


def ln_mlp_residual(x2d, gamma, beta, w1, b1, w2, b2, eps=1e-5):
    """Fused LN + MLP(GELU) + residual add."""
    M, K = x2d.shape
    hidden = w1.shape[1]
    tm, Mp = _pick_tile(M)
    xp = jnp.pad(x2d, ((0, Mp - M), (0, 0)))
    out = pl.pallas_call(
        functools.partial(_ln_mlp_kernel, eps=eps),
        out_shape=jax.ShapeDtypeStruct((Mp, K), x2d.dtype),
        grid=(Mp // tm,),
        in_specs=[pl.BlockSpec((tm, K), lambda i: (i, 0)),
                  pl.BlockSpec((1, K), lambda i: (0, 0)),
                  pl.BlockSpec((1, K), lambda i: (0, 0)),
                  pl.BlockSpec((K, hidden), lambda i: (0, 0)),
                  pl.BlockSpec((1, hidden), lambda i: (0, 0)),
                  pl.BlockSpec((hidden, K), lambda i: (0, 0)),
                  pl.BlockSpec((1, K), lambda i: (0, 0))],
        out_specs=pl.BlockSpec((tm, K), lambda i: (i, 0)),
        compiler_params=pltpu.CompilerParams(dimension_semantics=("parallel",)),
    )(xp, gamma.reshape(1, K), beta.reshape(1, K), w1, b1.reshape(1, hidden),
      w2, b2.reshape(1, K))
    return out[:M]


def fused_window_attention_block(z, qkv, gq, gk, scat, bias, wo, bo, *, nW, windowSize,
                                 receptiveSize, numHeads, headDim, scale):
    B, L, dim = z.shape
    HD = numHeads * headDim
    Lq = 1 + windowSize
    Lk = 1 + receptiveSize
    kernel = functools.partial(
        _attn_block_kernel, nW=nW, windowSize=windowSize, receptiveSize=receptiveSize,
        numHeads=numHeads, headDim=headDim, scale=scale)
    return pl.pallas_call(
        kernel,
        out_shape=jax.ShapeDtypeStruct((B, L, dim), z.dtype),
        grid=(B,),
        in_specs=[pl.BlockSpec((1, L, dim), lambda b: (b, 0, 0)),
                  pl.BlockSpec((1, L, 3 * HD), lambda b: (b, 0, 0)),
                  pl.BlockSpec((nW * Lq, L), lambda b: (0, 0)),
                  pl.BlockSpec((nW * Lk, L), lambda b: (0, 0)),
                  pl.BlockSpec((L, nW * Lq), lambda b: (0, 0)),
                  pl.BlockSpec((nW, Lk), lambda b: (0, 0)),
                  pl.BlockSpec((HD, dim), lambda b: (0, 0)),
                  pl.BlockSpec((1, dim), lambda b: (0, 0))],
        out_specs=pl.BlockSpec((1, L, dim), lambda b: (b, 0, 0)),
        compiler_params=pltpu.CompilerParams(dimension_semantics=("parallel",)),
    )(z, qkv, gq, gk, scat, bias, wo, bo.reshape(1, dim))


def postnorm_pool_head(cls, gamma, beta, w, b, eps=1e-5):
    """Fused encoder postNorm + cls mean-pool + classifier head."""
    B, nW, dim = cls.shape
    nC = w.shape[1]
    cls_out, logits = pl.pallas_call(
        functools.partial(_postnorm_pool_head_kernel, eps=eps),
        out_shape=(jax.ShapeDtypeStruct((B, nW, dim), cls.dtype),
                   jax.ShapeDtypeStruct((B, 1, nC), cls.dtype)),
        grid=(B,),
        in_specs=[pl.BlockSpec((1, nW, dim), lambda b: (b, 0, 0)),
                  pl.BlockSpec((1, dim), lambda b: (0, 0)),
                  pl.BlockSpec((1, dim), lambda b: (0, 0)),
                  pl.BlockSpec((dim, nC), lambda b: (0, 0)),
                  pl.BlockSpec((1, nC), lambda b: (0, 0))],
        out_specs=(pl.BlockSpec((1, nW, dim), lambda b: (b, 0, 0)),
                   pl.BlockSpec((1, 1, nC), lambda b: (b, 0, 0))),
        compiler_params=pltpu.CompilerParams(dimension_semantics=("parallel",)),
    )(cls, gamma.reshape(1, dim), beta.reshape(1, dim), w, b.reshape(1, nC))
    return logits.reshape(B, nC), cls_out


# ----------------------------- static window bookkeeping (host-side numpy) ----------------

def _build_window_maps(T, nW, windowSize, shiftSize):
    """Layer-invariant query gather matrix and overlap-averaging scatter matrix."""
    L = nW + T
    Lq = 1 + windowSize
    starts = np.arange(nW) * shiftSize

    gq = np.zeros((nW * Lq, L), np.float32)          # (cls_w ; window_w tokens) gather
    for w in range(nW):
        gq[w * Lq + 0, w] = 1.0
        for j in range(windowSize):
            gq[w * Lq + 1 + j, nW + starts[w] + j] = 1.0

    counts = np.zeros((T,), np.float64)              # how many windows cover each token
    for w in range(nW):
        counts[starts[w]:starts[w] + windowSize] += 1.0

    scat = np.zeros((L, nW * Lq), np.float32)        # writeback: cls pass-through, tokens averaged
    for w in range(nW):
        scat[w, w * Lq + 0] = 1.0
        for j in range(windowSize):
            t = starts[w] + j
            scat[nW + t, w * Lq + 1 + j] = 1.0 / counts[t]
    # Tokens past the last full window have all-zero scatter rows -> no attention update,
    # matching the reference fused-window gather-back behavior.
    return jnp.asarray(gq), jnp.asarray(scat)


def _build_key_maps(T, nW, windowSize, shiftSize, receptiveSize):
    """Per-layer key/value gather matrix and key-validity bias (OOB keys masked)."""
    L = nW + T
    Lk = 1 + receptiveSize
    fringe = (receptiveSize - windowSize) // 2
    starts = np.arange(nW) * shiftSize

    gk = np.zeros((nW * Lk, L), np.float32)
    valid = np.zeros((nW, Lk), bool)
    valid[:, 0] = True                                # per-window cls key always valid
    for w in range(nW):
        gk[w * Lk + 0, w] = 1.0
        for j in range(receptiveSize):
            idx = starts[w] - fringe + j
            if 0 <= idx < T:
                gk[w * Lk + 1 + j, nW + idx] = 1.0
                valid[w, 1 + j] = True
    bias = np.where(valid, 0.0, -1e9).astype(np.float32)
    return jnp.asarray(gk), jnp.asarray(bias)


# ----------------------------- BolT transformer block -----------------------------
# NOTE: BolTransformerBlock source is not part of the provided module; this implements the
# BolT-paper fused-window MSA block (pre-LN attention over [cls_w ; window] queries against
# [cls_w ; receptive-field] keys, overlap-averaged writeback, pre-LN MLP).

def transformer_block(z, p, gq, gk, scat, bias, *, nW, windowSize, receptiveSize,
                      numHeads, headDim):
    B, L, dim = z.shape
    HD = numHeads * headDim
    scale = headDim ** -0.5

    # (A) fused LN + QKV projection over all B*L rows
    qkv = ln_matmul(z.reshape(B * L, dim), p["attn_norm_g"], p["attn_norm_b"],
                    p["wqkv"], p["bqkv"]).reshape(B, L, 3 * HD)

    # (B) fused window attention + wo projection + overlap-average writeback + residual
    z = fused_window_attention_block(
        z, qkv, gq, gk, scat, bias, p["wo"], p["bo"],
        nW=nW, windowSize=windowSize, receptiveSize=receptiveSize,
        numHeads=numHeads, headDim=headDim, scale=scale)

    # (C) fused LN + MLP + residual
    z = ln_mlp_residual(z.reshape(B * L, dim), p["mlp_norm_g"], p["mlp_norm_b"],
                        p["w1"], p["b1"], p["w2"], p["b2"]).reshape(B, L, dim)
    return z


# ----------------------------- BolT forward -----------------------------

def bolt_forward(roiSignals, params, hp, nOfClasses):
    # roiSignals: (B, N=dim, T)  ->  (B, T, dim)
    x = jnp.transpose(roiSignals, (0, 2, 1))
    B, T, dim = x.shape
    windowSize = hp["windowSize"]
    shiftSize = int(windowSize * hp["shiftCoeff"])
    nW = (T - windowSize) // shiftSize + 1
    H, Dh = hp["numHeads"], hp["headDim"]

    # Static (host-side, layer-invariant) window gather / overlap-average scatter matrices.
    gq, scat = _build_window_maps(T, nW, windowSize, shiftSize)

    cls = jnp.broadcast_to(params["clsToken"], (B, nW, dim))   # clsToken.repeat(B, nW, 1)
    z = jnp.concatenate([cls, x], axis=1)                      # (B, nW + T, dim)

    for li in range(hp["nOfLayers"]):
        rs = params["receptiveSizes"][li]
        gk, bias = _build_key_maps(T, nW, windowSize, shiftSize, rs)
        z = transformer_block(z, params["blocks"][li], gq, gk, scat, bias,
                              nW=nW, windowSize=windowSize, receptiveSize=rs,
                              numHeads=H, headDim=Dh)

    cls = z[:, :nW]
    # method == 'concat', pooling == 'cls'  (postNorm + mean-pool + head fused in one kernel)
    logits, cls = postnorm_pool_head(cls, params["post_g"], params["post_b"],
                                     params["head_w"], params["head_b"])
    return logits, cls


# ----------------------------- deterministic parameter init -----------------------------

def init_params(key, hp, nOfClasses):
    dim, H, Dh = hp["dim"], hp["numHeads"], hp["headDim"]
    HD = H * Dh
    hidden = int(hp["mlpRatio"] * dim)
    windowSize = hp["windowSize"]
    keys = iter(jax.random.split(key, 128))

    def dense(k, fi, fo):
        return jax.random.normal(k, (fi, fo), jnp.float32) * 0.02

    params = {
        # nn.init.normal_(clsToken, std=1.0)
        "clsToken": jax.random.normal(next(keys), (1, 1, dim), jnp.float32),
        "post_g": jnp.ones((dim,), jnp.float32),
        "post_b": jnp.zeros((dim,), jnp.float32),
        "head_w": dense(next(keys), dim, nOfClasses),
        "head_b": jnp.zeros((nOfClasses,), jnp.float32),
    }
    # NOTE: inputNorm is declared in the PyTorch __init__ but never used in forward; omitted.

    receptiveSizes, blocks = [], []
    for i in range(hp["nOfLayers"]):
        if hp["focalRule"] == "expand":
            r = windowSize + math.ceil(windowSize * 2 * i * hp["fringeCoeff"] * (1 - hp["shiftCoeff"]))
        else:  # 'fixed'
            r = windowSize + math.ceil(windowSize * 2 * 1 * hp["fringeCoeff"] * (1 - hp["shiftCoeff"]))
        receptiveSizes.append(r)
        blocks.append(dict(
            attn_norm_g=jnp.ones((dim,), jnp.float32), attn_norm_b=jnp.zeros((dim,), jnp.float32),
            # fused QKV weight: (dim, 3*H*Dh)
            wqkv=dense(next(keys), dim, 3 * HD), bqkv=jnp.zeros((3 * HD,), jnp.float32),
            wo=dense(next(keys), HD, dim), bo=jnp.zeros((dim,), jnp.float32),
            mlp_norm_g=jnp.ones((dim,), jnp.float32), mlp_norm_b=jnp.zeros((dim,), jnp.float32),
            w1=dense(next(keys), dim, hidden), b1=jnp.zeros((hidden,), jnp.float32),
            w2=dense(next(keys), hidden, dim), b2=jnp.zeros((dim,), jnp.float32),
        ))
    params["blocks"] = blocks
    params["receptiveSizes"] = receptiveSizes
    return params


# ----------------------------- main -----------------------------

if __name__ == "__main__":
    hp = dict(dim=32, numHeads=4, headDim=8, windowSize=4, shiftCoeff=0.5,
              fringeCoeff=2.0, focalRule="expand", nOfLayers=2, mlpRatio=1.0,
              attentionBias=True, drop=0.0, attnDrop=0.0, method="concat", pooling="cls")
    nOfClasses = 2

    key = jax.random.PRNGKey(0)
    kp, kx = jax.random.split(key)
    params = init_params(kp, hp, nOfClasses)

    B, N, T = 2, hp["dim"], 16                      # roiSignals: (batchSize, N, dynamicLength)
    roiSignals = jax.random.normal(kx, (B, N, T), jnp.float32)

    logits, cls = bolt_forward(roiSignals, params, hp, nOfClasses)
    jax.block_until_ready((logits, cls))

    nW = (T - hp["windowSize"]) // int(hp["windowSize"] * hp["shiftCoeff"]) + 1
    assert logits.shape == (B, nOfClasses)
    assert cls.shape == (B, nW, hp["dim"])
    assert jnp.all(jnp.isfinite(logits)) and jnp.all(jnp.isfinite(cls))
    print("KERNEL_OK")
</pallas_src>

<mosaic_0001>
module attributes {stable_mosaic.version = 11 : i64} {
  func.func @_ln_matmul_kernel(%arg0: i32, %arg1: memref<48x32xf32, #tpu.memory_space<vmem>>, %arg2: memref<1x32xf32, #tpu.memory_space<vmem>>, %arg3: memref<1x32xf32, #tpu.memory_space<vmem>>, %arg4: memref<32x96xf32, #tpu.memory_space<vmem>>, %arg5: memref<1x96xf32, #tpu.memory_space<vmem>>, %arg6: memref<48x96xf32, #tpu.memory_space<vmem>>) attributes {dimension_semantics = [#tpu.dimension_semantics<parallel>], iteration_bounds = array<i64: 1>, scalar_prefetch = 0 : i64, scratch_operands = 0 : i64, tpu.core_type = #tpu.core_type<tc>, window_params = [{transform_indices = @transform_0, window_bounds = array<i64: 48, 32>}, {pipeline_mode = #tpu.pipeline_mode<synchronous>, transform_indices = @transform_1, window_bounds = array<i64: 1, 32>}, {pipeline_mode = #tpu.pipeline_mode<synchronous>, transform_indices = @transform_2, window_bounds = array<i64: 1, 32>}, {pipeline_mode = #tpu.pipeline_mode<synchronous>, transform_indices = @transform_3, window_bounds = array<i64: 32, 96>}, {pipeline_mode = #tpu.pipeline_mode<synchronous>, transform_indices = @transform_4, window_bounds = array<i64: 1, 96>}, {transform_indices = @transform_5, window_bounds = array<i64: 48, 96>}]} {
    %c0 = arith.constant 0 : index
    %c0_0 = arith.constant 0 : index
    %0 = vector.load %arg1[%c0, %c0_0] : memref<48x32xf32, #tpu.memory_space<vmem>>, vector<48x32xf32>
    %cst = arith.constant dense<0.000000e+00> : vector<48xf32>
    %1 = vector.multi_reduction <add>, %0, %cst [1] : vector<48x32xf32> to vector<48xf32>
    %2 = vector.shape_cast %1 : vector<48xf32> to vector<48x1xf32>
    %cst_1 = arith.constant 3.200000e+01 : f32
    %3 = vector.broadcast %cst_1 : f32 to vector<48x1xf32>
    %4 = arith.divf %2, %3 : vector<48x1xf32>
    %5 = vector.broadcast %4 : vector<48x1xf32> to vector<48x32xf32>
    %6 = arith.subf %0, %5 : vector<48x32xf32>
    %7 = arith.mulf %6, %6 : vector<48x32xf32>
    %cst_2 = arith.constant dense<0.000000e+00> : vector<48xf32>
    %8 = vector.multi_reduction <add>, %7, %cst_2 [1] : vector<48x32xf32> to vector<48xf32>
    %9 = vector.shape_cast %8 : vector<48xf32> to vector<48x1xf32>
    %cst_3 = arith.constant 3.200000e+01 : f32
    %10 = vector.broadcast %cst_3 : f32 to vector<48x1xf32>
    %11 = arith.divf %9, %10 : vector<48x1xf32>
    %12 = vector.broadcast %4 : vector<48x1xf32> to vector<48x32xf32>
    %13 = arith.subf %0, %12 : vector<48x32xf32>
    %cst_4 = arith.constant 9.99999974E-6 : f32
    %14 = vector.broadcast %cst_4 : f32 to vector<48x1xf32>
    %15 = arith.addf %11, %14 : vector<48x1xf32>
    %16 = math.rsqrt %15 : vector<48x1xf32>
    %17 = vector.broadcast %16 : vector<48x1xf32> to vector<48x32xf32>
    %18 = arith.mulf %13, %17 : vector<48x32xf32>
    %c0_5 = arith.constant 0 : index
    %c0_6 = arith.constant 0 : index
    %19 = vector.load %arg2[%c0_5, %c0_6] : memref<1x32xf32, #tpu.memory_space<vmem>>, vector<1x32xf32>
    %20 = vector.broadcast %19 : vector<1x32xf32> to vector<48x32xf32>
    %21 = arith.mulf %18, %20 : vector<48x32xf32>
    %c0_7 = arith.constant 0 : index
    %c0_8 = arith.constant 0 : index
    %22 = vector.load %arg3[%c0_7, %c0_8] : memref<1x32xf32, #tpu.memory_space<vmem>>, vector<1x32xf32>
    %23 = vector.broadcast %22 : vector<1x32xf32> to vector<48x32xf32>
    %24 = arith.addf %21, %23 : vector<48x32xf32>
    %c0_9 = arith.constant 0 : index
    %c0_10 = arith.constant 0 : index
    %25 = vector.load %arg4[%c0_9, %c0_10] : memref<32x96xf32, #tpu.memory_space<vmem>>, vector<32x96xf32>
    %cst_11 = arith.constant dense<0.000000e+00> : vector<48x96xf32>
    %26 = tpu.matmul %24, %25, %cst_11 {dimension_numbers = #tpu.dot_dimension_numbers<[1], [0], [0], [1], [0, 0, 1, 1], [], []>} : vector<48x32xf32>, vector<32x96xf32>, vector<48x96xf32> -> vector<48x96xf32>
    %c0_12 = arith.constant 0 : index
    %c0_13 = arith.constant 0 : index
    %27 = vector.load %arg5[%c0_12, %c0_13] : memref<1x96xf32, #tpu.memory_space<vmem>>, vector<1x96xf32>
    %28 = vector.broadcast %27 : vector<1x96xf32> to vector<48x96xf32>
    %29 = arith.addf %26, %28 : vector<48x96xf32>
    %c0_14 = arith.constant 0 : index
    %c0_15 = arith.constant 0 : index
    %30 = vector.load %arg6[%c0_14, %c0_15] : memref<48x96xf32, #tpu.memory_space<vmem>>, vector<48x96xf32>
    tpu.vector_store %arg6[%c0_14, %c0_15], %29 {strides = array<i32>} : memref<48x96xf32, #tpu.memory_space<vmem>>, vector<48x96xf32>,
    return
  }
  func.func @transform_0(%arg0: i32) -> (i32, i32) {
    %c0_i32 = arith.constant 0 : i32
    %c0_i32_0 = arith.constant 0 : i32
    return %arg0, %c0_i32 : i32, i32
  }
  func.func @transform_1(%arg0: i32) -> (i32, i32) {
    %c0_i32 = arith.constant 0 : i32
    %c0_i32_0 = arith.constant 0 : i32
    %c0_i32_1 = arith.constant 0 : i32
    return %c0_i32, %c0_i32_0 : i32, i32
  }
  func.func @transform_2(%arg0: i32) -> (i32, i32) {
    %c0_i32 = arith.constant 0 : i32
    %c0_i32_0 = arith.constant 0 : i32
    %c0_i32_1 = arith.constant 0 : i32
    return %c0_i32, %c0_i32_0 : i32, i32
  }
  func.func @transform_3(%arg0: i32) -> (i32, i32) {
    %c0_i32 = arith.constant 0 : i32
    %c0_i32_0 = arith.constant 0 : i32
    %c0_i32_1 = arith.constant 0 : i32
    return %c0_i32, %c0_i32_0 : i32, i32
  }
  func.func @transform_4(%arg0: i32) -> (i32, i32) {
    %c0_i32 = arith.constant 0 : i32
    %c0_i32_0 = arith.constant 0 : i32
    %c0_i32_1 = arith.constant 0 : i32
    return %c0_i32, %c0_i32_0 : i32, i32
  }
  func.func @transform_5(%arg0: i32) -> (i32, i32) {
    %c0_i32 = arith.constant 0 : i32
    %c0_i32_0 = arith.constant 0 : i32
    return %arg0, %c0_i32 : i32, i32
  }
}

</mosaic_0001>

<bundles_post_ra>
// kernel: tpu_custom_call.1
= control target key start
LH: loop header
LB: loop body
LE: loop exit
PB: predicated region body
PF: predicated region fallthrough
CT: control target
= control target key end

     0   :  { %vm27_vm0 = vcmask 261120   ;;  %s490_s0 = inlined_call_operand.vmem [shape: f32[48,32], index: 0, kind: input, shape index: {}]   ;;  %s491_s1 = inlined_call_operand.vmem [shape: f32[1,32], index: 1, kind: input, shape index: {}]   ;;  %s492_s2 = inlined_call_operand.vmem [shape: f32[1,32], index: 2, kind: input, shape index: {}]   ;;  %s493_s3 = inlined_call_operand.vmem [shape: f32[32,96], index: 3, kind: input, shape index: {}]   ;;  %s494_s4 = inlined_call_operand.vmem [shape: f32[1,96], index: 4, kind: input, shape index: {}]   ;;  %s495_s5 = inlined_call_operand.hbm [shape: f32[48,96], index: 5, kind: output, shape index: {}]  }
   0x1   :  { %v23_v0 = vld [vmem:[%s490_s0 + $0x10] sm:$0xff]  ;;  %v24_v1 = vld [vmem:[%s490_s0 + $0x18] sm:$0xff]  ;;  %v21_v2 = vld [vmem:[%s490_s0] sm:$0xff] }
   0x2   :  { %v34_v3 = vsel %vm27_vm0, %v23_v0, 0.0  ;;  %v28_v4 = vsel %vm27_vm0, %v21_v2, 0.0  ;;  %v25_v5 = vld [vmem:[%s490_s0 + $0x20] sm:$0xff] }
   0x3   :  { %35 = vadd.xlane.f32.xlu0 %v34_v3  ;;  %29 = vadd.xlane.f32.xlu1 %v28_v4 }
   0x4   :  { %10 = vsyncpa [#allocation3], 0  ;;  %v37_v6 = vsel %vm27_vm0, %v24_v1, 0.0  ;;  %v40_v7 = vsel %vm27_vm0, %v25_v5, 0.0  ;;  %v22_v8 = vld [vmem:[%s490_s0 + $0x8] sm:$0xff]  ;;  %v136_v42 = vld [vmem:[%s493_s3 + $0x18] sm:$0xff] }
   0x5   :  { %v26_v9 = vld [vmem:[%s490_s0 + $0x28] sm:$0xff]  ;;  %v31_v10 = vsel %vm27_vm0, %v22_v8, 0.0  ;;  %v135_v43 = vld [vmem:[%s493_s3 + $0x10] sm:$0xff]  ;;  %316 = vmatprep.subr.mxu1 %v136_v42  ;;  %299 = vmatprep.subr.mxu0 %v136_v42  ;;  %v133_v45 = vld [vmem:[%s493_s3] sm:$0xff]  ;;  %vm257_vm1 = vcmask 785408   ;;  %s361_s15 = smov [#allocation2]  }
   0x6   :  { %v43_v11 = vsel %vm27_vm0, %v26_v9, 0.0  ;;  %320 = vmatpush3.msra.mxu1 %v136_v42  ;;  %v134_v44 = vld [vmem:[%s493_s3 + $0x8] sm:$0xff]  ;;  %300 = vmatpush3.msra.mxu0 %v136_v42  ;;  %v281_v3 = vld [vmem:[%s492_s2] ss:$0 sm:$0xff]  ;;  %s269_s16 = sshll.u32 %s361_s15, 4  ;;  %s270_s16 = int_to_ptr.vmem [resolvable:$true] %s269_s16 }
   0x7   :  { %38 = vadd.xlane.f32.xlu0 %v37_v6  ;;  %41 = vadd.xlane.f32.xlu1 %v40_v7  ;;  %p344_p1 = scmp.lt.s32.totalorder %s270_s16, %s270_s16 }
   0x8   :  { %317 = vmatprep.subr.mxu1 %v135_v43  ;;  %301 = vmatprep.subr.mxu0 %v135_v43 }
   0x9   :  { %321 = vmatpush3.msra.mxu1 %v135_v43  ;;  %302 = vmatpush3.msra.mxu0 %v135_v43 }
   0xa   :  { %318 = vmatprep.subr.mxu1 %v134_v44  ;;  %303 = vmatprep.subr.mxu0 %v134_v44 }
   0xb   :  { %32 = vadd.xlane.f32.xlu0 %v31_v10  ;;  %44 = vadd.xlane.f32.xlu1 %v43_v11 }
   0xc   :  { %322 = vmatpush3.msra.mxu1 %v134_v44  ;;  %304 = vmatpush3.msra.mxu0 %v134_v44 }
   0xd   :  { %319 = vmatprep.subr.mxu1 %v133_v45  ;;  %305 = vmatprep.subr.mxu0 %v133_v45 }
   0xe   :  { %323 = vmatpush3.msra.mxu1 %v133_v45  ;;  %306 = vmatpush3.msra.mxu0 %v133_v45 }
  0x8c   :  { %v36_v12 = vpop.xlane.xlu0 %35  ;;  %v30_v13 = vpop.xlane.xlu1 %29 }
  0x8d   :  { %v49_v14 = vmul.f32 0.03125, %v36_v12  ;;  %v47_v15 = vmul.f32 0.03125, %v30_v13 }
  0x8f   :  { %v418_v16 = vsub.f32 %v23_v0, %v49_v14  ;;  %v420_v17 = vsub.f32 %v21_v2, %v47_v15 }
  0x90   :  { %v39_v18 = vpop.xlane.xlu0 %38  ;;  %v42_v19 = vpop.xlane.xlu1 %41 }
  0x91   :  { %v50_v20 = vmul.f32 0.03125, %v39_v18  ;;  %v61_v21 = vmul.f32 %v418_v16, %v418_v16  ;;  %v51_v22 = vmul.f32 0.03125, %v42_v19  ;;  %v59_v23 = vmul.f32 %v420_v17, %v420_v17 }
  0x93   :  { %v426_v24 = vsub.f32 %v24_v1, %v50_v20  ;;  %v71_v25 = vsel %vm27_vm0, %v61_v21, 0.0  ;;  %v429_v26 = vsub.f32 %v25_v5, %v51_v22  ;;  %v65_v28 = vsel %vm27_vm0, %v59_v23, 0.0  ;;  %v280_v1 = vld [vmem:[%s491_s1] ss:$0 sm:$0xff] }
  0x94   :  { %72 = vadd.xlane.f32.xlu0 %v71_v25  ;;  %v33_v27 = vpop.xlane.xlu0 %32  ;;  %v45_v29 = vpop.xlane.xlu1 %44 }
  0x95   :  { %v48_v30 = vmul.f32 0.03125, %v33_v27  ;;  %v62_v31 = vmul.f32 %v426_v24, %v426_v24  ;;  %v52_v32 = vmul.f32 0.03125, %v45_v29  ;;  %v63_v33 = vmul.f32 %v429_v26, %v429_v26 }
  0x97   :  { %v436_v34 = vsub.f32 %v22_v8, %v48_v30  ;;  %v74_v35 = vsel %vm27_vm0, %v62_v31, 0.0  ;;  %v439_v36 = vsub.f32 %v26_v9, %v52_v32  ;;  %v77_v38 = vsel %vm27_vm0, %v63_v33, 0.0 }
  0x98   :  { %75 = vadd.xlane.f32.xlu1 %v74_v35  ;;  %66 = vadd.xlane.f32.xlu0 %v65_v28 }
  0x99   :  { %v60_v37 = vmul.f32 %v436_v34, %v436_v34  ;;  %v64_v39 = vmul.f32 %v439_v36, %v439_v36 }
  0x9b   :  { %v68_v40 = vsel %vm27_vm0, %v60_v37, 0.0  ;;  %v80_v41 = vsel %vm27_vm0, %v64_v39, 0.0 }
  0x9c   :  { %69 = vadd.xlane.f32.xlu0 %v68_v40  ;;  %78 = vadd.xlane.f32.xlu1 %v77_v38 }
  0xa0   :  { %81 = vadd.xlane.f32.xlu1 %v80_v41 }
 0x11d   :  { %v73_v46 = vpop.xlane.xlu0 %72 }
 0x11e   :  { %v85_v47 = vmul.f32 0.03125, %v73_v46 }
 0x120   :  { %v91_v48 = vadd.f32 1e-05, %v85_v47 }
 0x121   :  { %v67_v49 = vpop.xlane.xlu0 %66  ;;  %v76_v50 = vpop.xlane.xlu1 %75 }
 0x122   :  { %327 = vrsqrt.f32 %v91_v48  ;;  %v83_v51 = vmul.f32 0.03125, %v67_v49  ;;  %v86_v52 = vmul.f32 0.03125, %v76_v50 }
 0x124   :  { %v89_v53 = vadd.f32 1e-05, %v83_v51  ;;  %v92_v54 = vadd.f32 1e-05, %v86_v52 }
 0x125   :  { %v70_v55 = vpop.xlane.xlu0 %69  ;;  %v79_v56 = vpop.xlane.xlu1 %78 }
 0x126   :  { %329 = vrsqrt.f32 %v89_v53  ;;  %v84_v57 = vmul.f32 0.03125, %v70_v55  ;;  %v87_v58 = vmul.f32 0.03125, %v79_v56 }
 0x127   :  { %331 = vrsqrt.f32 %v92_v54 }
 0x128   :  { %v90_v59 = vadd.f32 1e-05, %v84_v57  ;;  %v93_v60 = vadd.f32 1e-05, %v87_v58 }
 0x129   :  { %v82_v61 = vpop.xlane.xlu1 %81 }
 0x12a   :  { %333 = vrsqrt.f32 %v90_v59  ;;  %v88_v62 = vmul.f32 0.03125, %v82_v61 }
 0x12b   :  { %335 = vrsqrt.f32 %v93_v60 }
 0x12c   :  { %v94_v63 = vadd.f32 1e-05, %v88_v62 }
 0x12e   :  { %337 = vrsqrt.f32 %v94_v63 }
 0x12f   :  { %v328_v0 = vpop.eup %327 }
 0x130   :  { %v103_v2 = vmul.f32 %v328_v0, %v418_v16 }
 0x132   :  { %v116_v4 = vmul.f32 %v280_v1, %v103_v2 }
 0x133   :  { %v330_v5 = vpop.eup %329 }
 0x134   :  { %v332_v6 = vpop.eup %331  ;;  %v129_v7 = vadd.f32 %v281_v3, %v116_v4  ;;  %v101_v8 = vmul.f32 %v330_v5, %v420_v17 }
 0x135   :  { %v104_v9 = vmul.f32 %v332_v6, %v426_v24 }
 0x136   :  { %310 = vmatprep.mubr.msk.f32.mxu1 %vm27_vm0, %v129_v7  ;;  %v114_v10 = vmul.f32 %v280_v1, %v101_v8 }
 0x137   :  { %v334_v11 = vpop.eup %333  ;;  %v117_v12 = vmul.f32 %v280_v1, %v104_v9 }
 0x138   :  { %v336_v13 = vpop.eup %335  ;;  %v127_v14 = vadd.f32 %v281_v3, %v114_v10  ;;  %v102_v15 = vmul.f32 %v334_v11, %v436_v34 }
 0x139   :  { %v130_v16 = vadd.f32 %v281_v3, %v117_v12  ;;  %v105_v18 = vmul.f32 %v336_v13, %v429_v26  ;;  %v282_v26 = vld [vmem:[%s494_s4] ss:$0 sm:$0xff]  ;;  %s339_s4 = scalar_lea.vmem %s270_s16, 768 }
 0x13a   :  { %307 = vmatprep.mubr.msk.f32.mxu0 %vm27_vm0, %v127_v14  ;;  %v115_v19 = vmul.f32 %v280_v1, %v102_v15  ;;  %p340_p0 = scmp.ne.s32.totalorder %s270_s16, %s339_s4  ;;  %p345_p2 = scmp.lt.s32.totalorder %s339_s4, %s339_s4 }
 0x13b   :  { %v338_v20 = vpop.eup %337  ;;  %311 = vmatmul.mubr.msk.f32.vlgmr.msra.gmra.mxu1 %vm27_vm0, %v130_v16  ;;  %v118_v17 = vmul.f32 %v280_v1, %v105_v18 }
 0x13c   :  { %v128_v21 = vadd.f32 %v281_v3, %v115_v19  ;;  %v106_v22 = vmul.f32 %v338_v20, %v439_v36  ;;  %p346_p3 = por %p345_p2, %p344_p1 }
 0x13d   :  { %v131_v23 = vadd.f32 %v281_v3, %v118_v17 }
 0x13e   :  { %308 = vmatmul.mubr.msk.f32.vlgmr.msra.gmra.mxu0 %vm27_vm0, %v128_v21  ;;  %v119_v24 = vmul.f32 %v280_v1, %v106_v22  ;;  %p347_p4 = pnand %p346_p3, %p340_p0 }
 0x13f   :  { %313 = vmatprep.mubr.msk.f32.mxu1 %vm27_vm0, %v131_v23 }
 0x140   :  { %v132_v25 = vadd.f32 %v281_v3, %v119_v24 }
 0x142   :  { %314 = vmatmul.mubr.msk.f32.gmra.mxu1 %vm27_vm0, %v132_v25 }
 0x1fb   :  { %v312_v27 = vpop.f32.mrf.mxu1 }
 0x1fc   :  { %v244_v28 = vadd.f32 %v312_v27, %v282_v26 }
 0x1fd   :  { %v238_v29 = vpop.f32.mrf.mxu1 }
 0x1fe   :  { %261 = vst.msk [vmem:[#allocation2 + $0x18] sm:$0xff] %vm257_vm1, %v244_v28  ;;  %v239_v30 = vadd.f32 %v282_v26, %v238_v29  ;;  %v309_v31 = vpop.f32.mrf.mxu0 }
 0x1ff   :  { %v234_v32 = vadd.f32 %v309_v31, %v282_v26 }
 0x200   :  { %260 = vst.msk [vmem:[#allocation2 + $0x10] sm:$0xff] %vm257_vm1, %v239_v30  ;;  %v228_v33 = vpop.f32.mrf.mxu0 }
 0x201   :  { %259 = vst.msk [vmem:[#allocation2 + $0x8] sm:$0xff] %vm257_vm1, %v234_v32  ;;  %v229_v34 = vadd.f32 %v282_v26, %v228_v33 }
 0x202   :  { %v315_v35 = vpop.f32.mrf.mxu1 }
 0x203   :  { %258 = vst.msk [vmem:[#allocation2] sm:$0xff] %vm257_vm1, %v229_v34  ;;  %v254_v36 = vadd.f32 %v315_v35, %v282_v26 }
 0x204   :  { %v248_v37 = vpop.f32.mrf.mxu1 }
 0x205   :  { %263 = vst.msk [vmem:[#allocation2 + $0x28] sm:$0xff] %vm257_vm1, %v254_v36  ;;  %v249_v38 = vadd.f32 %v282_v26, %v248_v37 }
 0x207   :  { %262 = vst.msk [vmem:[#allocation2 + $0x20] sm:$0xff] %vm257_vm1, %v249_v38 }
 0x208   :  { %350 = shalt.err (!%p347_p4)
}
 0x209   :  { %s362_s17 = smov 128   ;;  %s363_s18 = smov 8  }
 0x20a   :  { %275 = dma.vmem_to_hbm [thread:$0]  %s270_s16, 768, %s495_s5, [#allocation3], %s362_s17, %s362_s17, %s363_s18  }
 0x20b   :  { %359 = dma.done.wait [#allocation3], 768  }
 0x20c   :  { %360 = vsyncadd [#allocation3], 4294966528 }
 0x20d   :  { %279 = vsyncpa [#allocation3], 1 }

</bundles_post_ra>
